<compile_context>
chip_gen: v5e
topology: v5e:2x2
jax: 0.10.0
libtpu: 0.0.40
codegen_flags: <defaults>
</compile_context>

<pallas_src>
import jax
import jax.numpy as jnp
from jax.experimental import pallas as pl
from jax.experimental.pallas import tpu as pltpu

LANE = 128
BF16_SUBLANE = 16   # native bf16 tile is (16, 128)


def _round_up(n, m):
    return ((n + m - 1) // m) * m


def mlp_kernel(x_ref,
               w1_ref, b1_ref,
               w2_ref, b2_ref,
               w3_ref, b3_ref,
               w4_ref, b4_ref,
               o_ref):
    """One batch tile through all four layers.  Weights bf16, biases f32,
    f32 MXU accumulation, f32 output.  Intermediates stay in VMEM."""
    x = x_ref[...].astype(jnp.bfloat16)                              # (TB, 32)

    # inp_layer + ReLU
    h = jnp.dot(x, w1_ref[...], preferred_element_type=jnp.float32) + b1_ref[...]
    h = jnp.maximum(h, 0.0).astype(jnp.bfloat16)                     # (TB, 128)

    # fc1 + ReLU
    h = jnp.dot(h, w2_ref[...], preferred_element_type=jnp.float32) + b2_ref[...]
    h = jnp.maximum(h, 0.0).astype(jnp.bfloat16)                     # (TB, 256)

    # fc2 + ReLU
    h = jnp.dot(h, w3_ref[...], preferred_element_type=jnp.float32) + b3_ref[...]
    h = jnp.maximum(h, 0.0).astype(jnp.bfloat16)                     # (TB, 256)

    # out_layer (no activation) -> narrow (TB, 16) f32 writeback
    o_ref[...] = (jnp.dot(h, w4_ref[...], preferred_element_type=jnp.float32)
                  + b4_ref[...]).astype(o_ref.dtype)


def init_params(key, input_size, output_size, hidden=128):
    """f32 master params matching PyTorch nn.Linear default init
    (uniform +/- 1/sqrt(fan_in)); weights stored (in, out)."""
    dims = [(input_size, hidden),
            (hidden, hidden * 2),
            (hidden * 2, hidden * 2),
            (hidden * 2, output_size)]
    params = {}
    keys = jax.random.split(key, 2 * len(dims))
    for idx, (fan_in, fan_out) in enumerate(dims):
        bound = 1.0 / (fan_in ** 0.5)
        params[f"w{idx + 1}"] = jax.random.uniform(
            keys[2 * idx], (fan_in, fan_out),
            minval=-bound, maxval=bound, dtype=jnp.float32)
        params[f"b{idx + 1}"] = jax.random.uniform(
            keys[2 * idx + 1], (1, fan_out),
            minval=-bound, maxval=bound, dtype=jnp.float32)
    return params


def prepare_params(params):
    """Weights -> bf16 (MXU operands), biases stay f32.  No padding needed:
    the resident BlockSpecs cover the full arrays, which is always legal."""
    packed = {}
    for idx in range(1, 5):
        packed[f"w{idx}"] = params[f"w{idx}"].astype(jnp.bfloat16)
        packed[f"b{idx}"] = params[f"b{idx}"].astype(jnp.float32)
    return packed


def _pick_batch_tile(B, tb_max=1024):
    """Large tiles amortize per-grid-step overhead; for medium batches the
    tile is capped so the grid keeps >= 2 steps (v7x has 2 TensorCores).
    Multiples of 256 (16-row aligned for tiny batches, bf16 sublane tiling)."""
    if B <= 256:
        return _round_up(max(B, 1), BF16_SUBLANE)
    half = _round_up(pl.cdiv(B, 2), 256)
    return int(min(tb_max, half))


def simple_mlp_forward(x, packed, *, tb_max=1024):
    """x: (B, input_size) f32.  packed: prepare_params() output.
    Returns (B, output_size) f32."""
    B, in_dim = x.shape
    out_dim = packed["w4"].shape[1]
    h1 = packed["w1"].shape[1]
    h2 = packed["w2"].shape[1]

    tb = _pick_batch_tile(B, tb_max)
    b_pad = _round_up(B, tb)
    grid = (b_pad // tb,)
    if b_pad != B:
        x = jnp.pad(x, ((0, b_pad - B), (0, 0)))  # only the last tile is padded

    def batch_tiled(width):
        # x / out tiles march over the batch axis (double-buffered pipeline).
        return pl.BlockSpec((tb, width), lambda i: (i, 0))

    def resident(shape):
        # Same block every grid step -> DMA'd once, VMEM-resident.
        return pl.BlockSpec(shape, lambda i: (0, 0))

    in_specs = [batch_tiled(in_dim)]
    args = [x]
    for idx in range(1, 5):
        w = packed[f"w{idx}"]
        b = packed[f"b{idx}"]
        in_specs += [resident(w.shape), resident(b.shape)]
        args += [w, b]

    # VMEM budget from actual footprint: double-buffered x/out tiles +
    # (double-buffered) resident params + live f32/bf16 intermediates, with
    # ~2x slack for compiler scratch.  ~4-10 MiB at tb=1024 -- far below the
    # 64 MiB (v7x) / 128 MiB (v5e/v6e) physical VMEM.
    param_bytes = sum(int(a.size) * a.dtype.itemsize for a in args[1:])
    io_bytes = 2 * tb * (in_dim * 4 + out_dim * 4)
    act_bytes = tb * 6 * (h1 + 2 * h2)          # f32 + bf16 copy per activation
    vmem_limit = int(min(32 << 20,
                         max(8 << 20,
                             2 * (io_bytes + 2 * param_bytes + act_bytes))))

    out_p = pl.pallas_call(
        mlp_kernel,
        out_shape=jax.ShapeDtypeStruct((b_pad, out_dim), jnp.float32),
        grid_spec=pltpu.PrefetchScalarGridSpec(
            num_scalar_prefetch=0,
            grid=grid,
            in_specs=in_specs,
            out_specs=batch_tiled(out_dim),
        ),
        compiler_params=pltpu.CompilerParams(
            dimension_semantics=("parallel",),
            vmem_limit_bytes=vmem_limit,
        ),
    )(*args)

    return out_p[:B]


def _reference(x, params):
    h = jnp.maximum(x @ params["w1"] + params["b1"], 0.0)
    h = jnp.maximum(h @ params["w2"] + params["b2"], 0.0)
    h = jnp.maximum(h @ params["w3"] + params["b3"], 0.0)
    return h @ params["w4"] + params["b4"]


if __name__ == "__main__":
    key = jax.random.PRNGKey(0)
    k_param, k_x1, k_x2 = jax.random.split(key, 3)

    input_size, output_size = 32, 16
    params = init_params(k_param, input_size, output_size, hidden=128)
    packed = prepare_params(params)

    # Small batch: single 16-row tile, grid=(1,).
    B = 8
    x = jax.random.normal(k_x1, (B, input_size), dtype=jnp.float32)
    out = jax.block_until_ready(simple_mlp_forward(x, packed))
    ref = _reference(x, params)
    assert out.shape == (B, output_size)
    # bf16 MXU operands with f32 accumulation -> ~1% relative error budget.
    assert jnp.allclose(out, ref, atol=5e-2, rtol=5e-2), (
        float(jnp.max(jnp.abs(out - ref))))

    # Medium batch: non-divisible B, grid=(2,) -> exercises batch padding and
    # the megacore-friendly multi-tile path.
    B2 = 300
    x2 = jax.random.normal(k_x2, (B2, input_size), dtype=jnp.float32)
    out2 = jax.block_until_ready(simple_mlp_forward(x2, packed))
    ref2 = _reference(x2, params)
    assert out2.shape == (B2, output_size)
    assert jnp.allclose(out2, ref2, atol=5e-2, rtol=5e-2), (
        float(jnp.max(jnp.abs(out2 - ref2))))

    print("KERNEL_OK")
</pallas_src>

<mosaic_0001>
module attributes {stable_mosaic.version = 11 : i64} {
  func.func @mlp_kernel(%arg0: i32, %arg1: memref<16x32xf32, #tpu.memory_space<vmem>>, %arg2: memref<32x128xbf16, #tpu.memory_space<vmem>>, %arg3: memref<1x128xf32, #tpu.memory_space<vmem>>, %arg4: memref<128x256xbf16, #tpu.memory_space<vmem>>, %arg5: memref<1x256xf32, #tpu.memory_space<vmem>>, %arg6: memref<256x256xbf16, #tpu.memory_space<vmem>>, %arg7: memref<1x256xf32, #tpu.memory_space<vmem>>, %arg8: memref<256x16xbf16, #tpu.memory_space<vmem>>, %arg9: memref<1x16xf32, #tpu.memory_space<vmem>>, %arg10: memref<16x16xf32, #tpu.memory_space<vmem>>) attributes {dimension_semantics = [#tpu.dimension_semantics<parallel>], iteration_bounds = array<i64: 1>, scalar_prefetch = 0 : i64, scratch_operands = 0 : i64, tpu.core_type = #tpu.core_type<tc>, window_params = [{transform_indices = @transform_0, window_bounds = array<i64: 16, 32>}, {pipeline_mode = #tpu.pipeline_mode<synchronous>, transform_indices = @transform_1, window_bounds = array<i64: 32, 128>}, {pipeline_mode = #tpu.pipeline_mode<synchronous>, transform_indices = @transform_2, window_bounds = array<i64: 1, 128>}, {pipeline_mode = #tpu.pipeline_mode<synchronous>, transform_indices = @transform_3, window_bounds = array<i64: 128, 256>}, {pipeline_mode = #tpu.pipeline_mode<synchronous>, transform_indices = @transform_4, window_bounds = array<i64: 1, 256>}, {pipeline_mode = #tpu.pipeline_mode<synchronous>, transform_indices = @transform_5, window_bounds = array<i64: 256, 256>}, {pipeline_mode = #tpu.pipeline_mode<synchronous>, transform_indices = @transform_6, window_bounds = array<i64: 1, 256>}, {pipeline_mode = #tpu.pipeline_mode<synchronous>, transform_indices = @transform_7, window_bounds = array<i64: 256, 16>}, {pipeline_mode = #tpu.pipeline_mode<synchronous>, transform_indices = @transform_8, window_bounds = array<i64: 1, 16>}, {transform_indices = @transform_9, window_bounds = array<i64: 16, 16>}]} {
    %c0 = arith.constant 0 : index
    %c0_0 = arith.constant 0 : index
    %0 = vector.load %arg1[%c0, %c0_0] : memref<16x32xf32, #tpu.memory_space<vmem>>, vector<16x32xf32>
    %1 = arith.truncf %0 : vector<16x32xf32> to vector<16x32xbf16>
    %c0_1 = arith.constant 0 : index
    %c0_2 = arith.constant 0 : index
    %2 = vector.load %arg2[%c0_1, %c0_2] : memref<32x128xbf16, #tpu.memory_space<vmem>>, vector<32x128xbf16>
    %cst = arith.constant dense<0.000000e+00> : vector<16x128xf32>
    %3 = tpu.matmul %1, %2, %cst {dimension_numbers = #tpu.dot_dimension_numbers<[1], [0], [0], [1], [0, 0, 1, 1], [], []>} : vector<16x32xbf16>, vector<32x128xbf16>, vector<16x128xf32> -> vector<16x128xf32>
    %c0_3 = arith.constant 0 : index
    %c0_4 = arith.constant 0 : index
    %4 = vector.load %arg3[%c0_3, %c0_4] : memref<1x128xf32, #tpu.memory_space<vmem>>, vector<1x128xf32>
    %5 = vector.broadcast %4 : vector<1x128xf32> to vector<16x128xf32>
    %6 = arith.addf %3, %5 : vector<16x128xf32>
    %cst_5 = arith.constant 0.000000e+00 : f32
    %7 = vector.broadcast %cst_5 : f32 to vector<16x128xf32>
    %8 = arith.maximumf %6, %7 : vector<16x128xf32>
    %9 = arith.truncf %8 : vector<16x128xf32> to vector<16x128xbf16>
    %c0_6 = arith.constant 0 : index
    %c0_7 = arith.constant 0 : index
    %10 = vector.load %arg4[%c0_6, %c0_7] : memref<128x256xbf16, #tpu.memory_space<vmem>>, vector<128x256xbf16>
    %cst_8 = arith.constant dense<0.000000e+00> : vector<16x256xf32>
    %11 = tpu.matmul %9, %10, %cst_8 {dimension_numbers = #tpu.dot_dimension_numbers<[1], [0], [0], [1], [0, 0, 1, 1], [], []>} : vector<16x128xbf16>, vector<128x256xbf16>, vector<16x256xf32> -> vector<16x256xf32>
    %c0_9 = arith.constant 0 : index
    %c0_10 = arith.constant 0 : index
    %12 = vector.load %arg5[%c0_9, %c0_10] : memref<1x256xf32, #tpu.memory_space<vmem>>, vector<1x256xf32>
    %13 = vector.broadcast %12 : vector<1x256xf32> to vector<16x256xf32>
    %14 = arith.addf %11, %13 : vector<16x256xf32>
    %cst_11 = arith.constant 0.000000e+00 : f32
    %15 = vector.broadcast %cst_11 : f32 to vector<16x256xf32>
    %16 = arith.maximumf %14, %15 : vector<16x256xf32>
    %17 = arith.truncf %16 : vector<16x256xf32> to vector<16x256xbf16>
    %c0_12 = arith.constant 0 : index
    %c0_13 = arith.constant 0 : index
    %18 = vector.load %arg6[%c0_12, %c0_13] : memref<256x256xbf16, #tpu.memory_space<vmem>>, vector<256x256xbf16>
    %cst_14 = arith.constant dense<0.000000e+00> : vector<16x256xf32>
    %19 = tpu.matmul %17, %18, %cst_14 {dimension_numbers = #tpu.dot_dimension_numbers<[1], [0], [0], [1], [0, 0, 1, 1], [], []>} : vector<16x256xbf16>, vector<256x256xbf16>, vector<16x256xf32> -> vector<16x256xf32>
    %c0_15 = arith.constant 0 : index
    %c0_16 = arith.constant 0 : index
    %20 = vector.load %arg7[%c0_15, %c0_16] : memref<1x256xf32, #tpu.memory_space<vmem>>, vector<1x256xf32>
    %21 = vector.broadcast %20 : vector<1x256xf32> to vector<16x256xf32>
    %22 = arith.addf %19, %21 : vector<16x256xf32>
    %cst_17 = arith.constant 0.000000e+00 : f32
    %23 = vector.broadcast %cst_17 : f32 to vector<16x256xf32>
    %24 = arith.maximumf %22, %23 : vector<16x256xf32>
    %25 = arith.truncf %24 : vector<16x256xf32> to vector<16x256xbf16>
    %c0_18 = arith.constant 0 : index
    %c0_19 = arith.constant 0 : index
    %26 = vector.load %arg8[%c0_18, %c0_19] : memref<256x16xbf16, #tpu.memory_space<vmem>>, vector<256x16xbf16>
    %cst_20 = arith.constant dense<0.000000e+00> : vector<16x16xf32>
    %27 = tpu.matmul %25, %26, %cst_20 {dimension_numbers = #tpu.dot_dimension_numbers<[1], [0], [0], [1], [0, 0, 1, 1], [], []>} : vector<16x256xbf16>, vector<256x16xbf16>, vector<16x16xf32> -> vector<16x16xf32>
    %c0_21 = arith.constant 0 : index
    %c0_22 = arith.constant 0 : index
    %28 = vector.load %arg9[%c0_21, %c0_22] : memref<1x16xf32, #tpu.memory_space<vmem>>, vector<1x16xf32>
    %29 = vector.broadcast %28 : vector<1x16xf32> to vector<16x16xf32>
    %30 = arith.addf %27, %29 : vector<16x16xf32>
    %c0_23 = arith.constant 0 : index
    %c0_24 = arith.constant 0 : index
    %31 = vector.load %arg10[%c0_23, %c0_24] : memref<16x16xf32, #tpu.memory_space<vmem>>, vector<16x16xf32>
    tpu.vector_store %arg10[%c0_23, %c0_24], %30 {strides = array<i32>} : memref<16x16xf32, #tpu.memory_space<vmem>>, vector<16x16xf32>,
    return
  }
  func.func @transform_0(%arg0: i32) -> (i32, i32) {
    %c0_i32 = arith.constant 0 : i32
    %c0_i32_0 = arith.constant 0 : i32
    return %arg0, %c0_i32 : i32, i32
  }
  func.func @transform_1(%arg0: i32) -> (i32, i32) {
    %c0_i32 = arith.constant 0 : i32
    %c0_i32_0 = arith.constant 0 : i32
    %c0_i32_1 = arith.constant 0 : i32
    return %c0_i32, %c0_i32_0 : i32, i32
  }
  func.func @transform_2(%arg0: i32) -> (i32, i32) {
    %c0_i32 = arith.constant 0 : i32
    %c0_i32_0 = arith.constant 0 : i32
    %c0_i32_1 = arith.constant 0 : i32
    return %c0_i32, %c0_i32_0 : i32, i32
  }
  func.func @transform_3(%arg0: i32) -> (i32, i32) {
    %c0_i32 = arith.constant 0 : i32
    %c0_i32_0 = arith.constant 0 : i32
    %c0_i32_1 = arith.constant 0 : i32
    return %c0_i32, %c0_i32_0 : i32, i32
  }
  func.func @transform_4(%arg0: i32) -> (i32, i32) {
    %c0_i32 = arith.constant 0 : i32
    %c0_i32_0 = arith.constant 0 : i32
    %c0_i32_1 = arith.constant 0 : i32
    return %c0_i32, %c0_i32_0 : i32, i32
  }
  func.func @transform_5(%arg0: i32) -> (i32, i32) {
    %c0_i32 = arith.constant 0 : i32
    %c0_i32_0 = arith.constant 0 : i32
    %c0_i32_1 = arith.constant 0 : i32
    return %c0_i32, %c0_i32_0 : i32, i32
  }
  func.func @transform_6(%arg0: i32) -> (i32, i32) {
    %c0_i32 = arith.constant 0 : i32
    %c0_i32_0 = arith.constant 0 : i32
    %c0_i32_1 = arith.constant 0 : i32
    return %c0_i32, %c0_i32_0 : i32, i32
  }
  func.func @transform_7(%arg0: i32) -> (i32, i32) {
    %c0_i32 = arith.constant 0 : i32
    %c0_i32_0 = arith.constant 0 : i32
    %c0_i32_1 = arith.constant 0 : i32
    return %c0_i32, %c0_i32_0 : i32, i32
  }
  func.func @transform_8(%arg0: i32) -> (i32, i32) {
    %c0_i32 = arith.constant 0 : i32
    %c0_i32_0 = arith.constant 0 : i32
    %c0_i32_1 = arith.constant 0 : i32
    return %c0_i32, %c0_i32_0 : i32, i32
  }
  func.func @transform_9(%arg0: i32) -> (i32, i32) {
    %c0_i32 = arith.constant 0 : i32
    %c0_i32_0 = arith.constant 0 : i32
    return %arg0, %c0_i32 : i32, i32
  }
}

</mosaic_0001>

<bundles_post_ra>
// kernel: tpu_custom_call.1
= control target key start
LH: loop header
LB: loop body
LE: loop exit
PB: predicated region body
PF: predicated region fallthrough
CT: control target
= control target key end

     0   :  { %14 = vsyncpa [#allocation3], 0  ;;  %s1380_s0 = inlined_call_operand.vmem [shape: f32[16,32], index: 0, kind: input, shape index: {}]   ;;  %s1381_s1 = inlined_call_operand.hbm [shape: bf16[32,128], index: 1, kind: input, shape index: {}]   ;;  %s1382_s2 = inlined_call_operand.hbm [shape: f32[1,128], index: 2, kind: input, shape index: {}]   ;;  %s1383_s3 = inlined_call_operand.vmem [shape: bf16[128,256], index: 3, kind: input, shape index: {}]   ;;  %s1384_s4 = inlined_call_operand.vmem [shape: f32[1,256], index: 4, kind: input, shape index: {}]   ;;  %s1385_s5 = inlined_call_operand.hbm [shape: bf16[256,256], index: 5, kind: input, shape index: {}]   ;;  %s1386_s6 = inlined_call_operand.vmem [shape: f32[1,256], index: 6, kind: input, shape index: {}]   ;;  %s1387_s7 = inlined_call_operand.vmem [shape: bf16[256,16], index: 7, kind: input, shape index: {}]   ;;  %s1388_s8 = inlined_call_operand.vmem [shape: f32[1,16], index: 8, kind: input, shape index: {}]   ;;  %s1389_s9 = inlined_call_operand.hbm [shape: f32[16,16], index: 9, kind: output, shape index: {}]  }
   0x1   :  { %15 = vsyncpa [#allocation6], 0  ;;  %s37_s11 = sshll.u32 %s1382_s2, 4  ;;  %s38_s11 = int_to_ptr.hbm [resolvable:$true] %s37_s11 }
   0x2   :  { %16 = vsyncpa [#allocation4], 0  ;;  %s1145_s12 = smov [#allocation5]   ;;  %s23_s16 = sshll.u32 %s1381_s1, 4  ;;  %s24_s16 = int_to_ptr.hbm [resolvable:$true] %s23_s16 }
   0x3   :  { %s39_s13 = sshll.u32 %s1145_s12, 4  ;;  %s1146_s17 = smov [#allocation2]   ;;  %s40_s13 = int_to_ptr.vmem [resolvable:$true] %s39_s13 }
   0x4   :  { %42 = dma.hbm_to_vmem [thread:$0]  %s38_s11, 16, %s40_s13, [#allocation6]  }
   0x5   :  { %s25_s18 = sshll.u32 %s1146_s17, 4  ;;  %s1147_s19 = smov 64   ;;  %s26_s18 = int_to_ptr.vmem [resolvable:$true] %s25_s18 }
   0x6   :  { %s1148_s20 = smov 4   ;;  %s51_s2 = sshll.u32 %s1385_s5, 4  ;;  %s52_s2 = int_to_ptr.hbm [resolvable:$true] %s51_s2 }
   0x7   :  { %31 = dma.hbm_to_vmem [thread:$0]  %s24_s16, 256, %s26_s18, [#allocation3], %s1147_s19, %s1147_s19, %s1148_s20  }
   0x8   :  { %s1149_s23 = smov [#allocation7]   ;;  %s1150_s25 = smov 128  }
   0x9   :  { %s53_s24 = sshll.u32 %s1149_s23, 4  ;;  %s1151_s26 = smov 8   ;;  %s54_s24 = int_to_ptr.vmem [resolvable:$true] %s53_s24 }
   0xa   :  { %59 = dma.hbm_to_vmem [thread:$0]  %s52_s2, 4096, %s54_s24, [#allocation6], %s1150_s25, %s1150_s25, %s1151_s26  }
   0xb   :  { %1139 = dma.done.wait [#allocation3], 256  }
   0xc   :  { %1140 = vsyncadd [#allocation3], 4294967040 }
   0xd   :  { %1141 = dma.done.wait [#allocation6], 4112  }
   0xe   :  { %1142 = vsyncadd [#allocation6], 4294963184  ;;  %v968_v0 = vld [vmem:[#allocation2 + $0x8] sm:$0xff]  ;;  %v967_v1 = vld [vmem:[#allocation2] sm:$0xff]  ;;  %vm102_vm0 = vcmask 261120   ;;  %vm679_vm1 = vcmask 130048  }
   0xf   :  { %v79_v2 = vld [vmem:[%s1380_s0] sm:$0xff]  ;;  %v80_v3 = vld [vmem:[%s1380_s0 + $0x8] sm:$0xff]  ;;  %v769_v4 = vld [vmem:[%s1383_s3 + $0x70] sm:$0xf]  ;;  %112 = vmatpush.bf16.msra.mxu0 %v968_v0  ;;  %s1152_s12 = smov [#allocation8]   ;;  %s688_s16 = sshll.u32 %s1389_s9, 4  ;;  %s689_s16 = int_to_ptr.hbm [resolvable:$true] %s688_s16 }
  0x10   :  { %v984_v5 = vld [vmem:[%s1383_s3 + $0x74] sm:$0xf0]  ;;  %v983_v7 = vld [vmem:[%s1383_s3 + $0x74] sm:$0xf]  ;;  %v771_v8 = vld [vmem:[%s1383_s3 + $0x78] sm:$0xf0]  ;;  %v81_v15 = vpack.c.bf16 %v80_v3, %v79_v2 }
  0x11   :  { %v770_v6 = vor.u32 %v984_v5, %v769_v4  ;;  %v761_v9 = vld [vmem:[%s1383_s3 + $0x60] sm:$0xf]  ;;  %v774_v10 = vor.u32 %v983_v7, %v771_v8  ;;  %v982_v11 = vld [vmem:[%s1383_s3 + $0x64] sm:$0xf0]  ;;  %v981_v12 = vld [vmem:[%s1383_s3 + $0x64] sm:$0xf] }
  0x12   :  { %v763_v13 = vld [vmem:[%s1383_s3 + $0x68] sm:$0xf0]  ;;  %v762_v14 = vor.u32 %v982_v11, %v761_v9  ;;  %v753_v17 = vld [vmem:[%s1383_s3 + $0x50] sm:$0xf]  ;;  %v980_v18 = vld [vmem:[%s1383_s3 + $0x54] sm:$0xf0] }
  0x13   :  { %225 = vmatpush.bf16.msra.mxu1 %v770_v6  ;;  %239 = vmatpush.bf16.msra.mxu2 %v774_v10  ;;  %v766_v16 = vor.u32 %v981_v12, %v763_v13  ;;  %v979_v19 = vld [vmem:[%s1383_s3 + $0x54] sm:$0xf]  ;;  %v755_v20 = vld [vmem:[%s1383_s3 + $0x58] sm:$0xf0]  ;;  %v754_v21 = vor.u32 %v980_v18, %v753_v17  ;;  %v745_v23 = vld [vmem:[%s1383_s3 + $0x40] sm:$0xf] }
  0x14   :  { %113 = vmatpush.bf16.msra.mxu0 %v967_v1  ;;  %v758_v22 = vor.u32 %v979_v19, %v755_v20  ;;  %v978_v24 = vld [vmem:[%s1383_s3 + $0x44] sm:$0xf0]  ;;  %v977_v25 = vld [vmem:[%s1383_s3 + $0x44] sm:$0xf]  ;;  %v747_v26 = vld [vmem:[%s1383_s3 + $0x48] sm:$0xf0] }
  0x15   :  { %v746_v27 = vor.u32 %v978_v24, %v745_v23  ;;  %v750_v28 = vor.u32 %v977_v25, %v747_v26  ;;  %v737_v29 = vld [vmem:[%s1383_s3 + $0x30] sm:$0xf]  ;;  %v976_v30 = vld [vmem:[%s1383_s3 + $0x34] sm:$0xf0]  ;;  %v975_v31 = vld [vmem:[%s1383_s3 + $0x34] sm:$0xf] }
  0x16   :  { %v738_v32 = vor.u32 %v976_v30, %v737_v29  ;;  %v739_v33 = vld [vmem:[%s1383_s3 + $0x38] sm:$0xf0]  ;;  %v729_v35 = vld [vmem:[%s1383_s3 + $0x20] sm:$0xf]  ;;  %v974_v36 = vld [vmem:[%s1383_s3 + $0x24] sm:$0xf0] }
  0x17   :  { %226 = vmatpush.bf16.msra.mxu1 %v762_v14  ;;  %710 = vmatmul.msk.bf16.vlgmr.msra.gmra.mxu0 %vm102_vm0, %v81_v15  ;;  %v742_v34 = vor.u32 %v975_v31, %v739_v33  ;;  %v973_v37 = vld [vmem:[%s1383_s3 + $0x24] sm:$0xf]  ;;  %v730_v38 = vor.u32 %v974_v36, %v729_v35  ;;  %v731_v39 = vld [vmem:[%s1383_s3 + $0x28] sm:$0xf0]  ;;  %v721_v41 = vld [vmem:[%s1383_s3 + $0x10] sm:$0xf] }
  0x18   :  { %240 = vmatpush.bf16.msra.mxu2 %v766_v16  ;;  %v734_v40 = vor.u32 %v973_v37, %v731_v39  ;;  %v972_v42 = vld [vmem:[%s1383_s3 + $0x14] sm:$0xf0]  ;;  %v971_v43 = vld [vmem:[%s1383_s3 + $0x14] sm:$0xf]  ;;  %v723_v45 = vld [vmem:[%s1383_s3 + $0x18] sm:$0xf0] }
  0x19   :  { %v722_v44 = vor.u32 %v972_v42, %v721_v41  ;;  %v726_v46 = vor.u32 %v971_v43, %v723_v45  ;;  %v713_v47 = vld [vmem:[%s1383_s3] sm:$0xf]  ;;  %v970_v48 = vld [vmem:[%s1383_s3 + $0x4] sm:$0xf0]  ;;  %v969_v49 = vld [vmem:[%s1383_s3 + $0x4] sm:$0xf] }
  0x1a   :  { %v714_v50 = vor.u32 %v970_v48, %v713_v47  ;;  %v715_v51 = vld [vmem:[%s1383_s3 + $0x8] sm:$0xf0]  ;;  %v833_v53 = vld [vmem:[#allocation7 + $0x70] sm:$0xf]  ;;  %v999_v55 = vld [vmem:[#allocation7 + $0x74] sm:$0xf] }
  0x1b   :  { %227 = vmatpush.bf16.msra.mxu1 %v754_v21  ;;  %v718_v52 = vor.u32 %v969_v49, %v715_v51  ;;  %v1000_v54 = vld [vmem:[#allocation7 + $0x74] sm:$0xf0]  ;;  %v835_v57 = vld [vmem:[#allocation7 + $0x78] sm:$0xf0]  ;;  %v825_v58 = vld [vmem:[#allocation7 + $0x60] sm:$0xf] }
  0x1c   :  { %241 = vmatpush.bf16.msra.mxu2 %v758_v22  ;;  %v834_v56 = vor.u32 %v1000_v54, %v833_v53  ;;  %v998_v59 = vld [vmem:[#allocation7 + $0x64] sm:$0xf0]  ;;  %v838_v60 = vor.u32 %v999_v55, %v835_v57  ;;  %v997_v61 = vld [vmem:[#allocation7 + $0x64] sm:$0xf]  ;;  %v827_v62 = vld [vmem:[#allocation7 + $0x68] sm:$0xf0] }
  0x1d   :  { %v897_v63 = vld [vmem:[#allocation7 + $0xf0] sm:$0xf]  ;;  %v826_v0 = vor.u32 %v998_v59, %v825_v58  ;;  %v1016_v1 = vld [vmem:[#allocation7 + $0xf4] sm:$0xf0]  ;;  %v1015_v2 = vld [vmem:[#allocation7 + $0xf4] sm:$0xf]  ;;  %v830_v4 = vor.u32 %v997_v61, %v827_v62 }
  0x1e   :  { %457 = vmatpush.bf16.msra.mxu3 %v834_v56  ;;  %v899_v3 = vld [vmem:[#allocation7 + $0xf8] sm:$0xf0]  ;;  %v898_v5 = vor.u32 %v1016_v1, %v897_v63  ;;  %v817_v7 = vld [vmem:[#allocation7 + $0x50] sm:$0xf]  ;;  %v996_v8 = vld [vmem:[#allocation7 + $0x54] sm:$0xf0] }
  0x1f   :  { %228 = vmatpush.bf16.msra.mxu1 %v746_v27  ;;  %v902_v6 = vor.u32 %v1015_v2, %v899_v3  ;;  %v995_v9 = vld [vmem:[#allocation7 + $0x54] sm:$0xf]  ;;  %v819_v10 = vld [vmem:[#allocation7 + $0x58] sm:$0xf0]  ;;  %v889_v11 = vld [vmem:[#allocation7 + $0xe0] sm:$0xf]  ;;  %v818_v16 = vor.u32 %v996_v8, %v817_v7 }
  0x20   :  { %242 = vmatpush.bf16.msra.mxu2 %v750_v28  ;;  %v1014_v12 = vld [vmem:[#allocation7 + $0xe4] sm:$0xf0]  ;;  %471 = vmatpush.bf16.msrb.mxu0 %v898_v5  ;;  %v1013_v14 = vld [vmem:[#allocation7 + $0xe4] sm:$0xf]  ;;  %v891_v15 = vld [vmem:[#allocation7 + $0xe8] sm:$0xf0]  ;;  %v822_v20 = vor.u32 %v995_v9, %v819_v10 }
  0x21   :  { %v890_v13 = vor.u32 %v1014_v12, %v889_v11  ;;  %v894_v17 = vor.u32 %v1013_v14, %v891_v15  ;;  %v809_v18 = vld [vmem:[#allocation7 + $0x40] sm:$0xf]  ;;  %v994_v19 = vld [vmem:[#allocation7 + $0x44] sm:$0xf0]  ;;  %v881_v21 = vld [vmem:[#allocation7 + $0xd0] sm:$0xf] }
  0x22   :  { %458 = vmatpush.bf16.msra.mxu3 %v826_v0  ;;  %v1012_v22 = vld [vmem:[#allocation7 + $0xd4] sm:$0xf0]  ;;  %v1011_v23 = vld [vmem:[#allocation7 + $0xd4] sm:$0xf]  ;;  %v993_v24 = vld [vmem:[#allocation7 + $0x44] sm:$0xf]  ;;  %v810_v29 = vor.u32 %v994_v19, %v809_v18 }
  0x23   :  { %229 = vmatpush.bf16.msra.mxu1 %v738_v32  ;;  %v811_v25 = vld [vmem:[#allocation7 + $0x48] sm:$0xf0]  ;;  %v883_v26 = vld [vmem:[#allocation7 + $0xd8] sm:$0xf0]  ;;  %v882_v27 = vor.u32 %v1012_v22, %v881_v21  ;;  %v801_v39 = vld [vmem:[#allocation7 + $0x30] sm:$0xf] }
  0x24   :  { %243 = vmatpush.bf16.msra.mxu2 %v742_v34  ;;  %472 = vmatpush.bf16.msrb.mxu0 %v890_v13  ;;  %v886_v28 = vor.u32 %v1011_v23, %v883_v26  ;;  %v814_v30 = vor.u32 %v993_v24, %v811_v25  ;;  %v1041_v32 = vld [vmem:[#allocation5] ss:$0 sm:$0xff]  ;;  %v991_v41 = vld [vmem:[#allocation7 + $0x34] sm:$0xf]  ;;  %v873_v45 = vld [vmem:[#allocation7 + $0xc0] sm:$0xf] }
  0x25   :  { %v803_v43 = vld [vmem:[#allocation7 + $0x38] sm:$0xf0]  ;;  %v1009_v47 = vld [vmem:[#allocation7 + $0xc4] sm:$0xf]  ;;  %v875_v49 = vld [vmem:[#allocation7 + $0xc8] sm:$0xf0] }
  0x26   :  { %459 = vmatpush.bf16.msra.mxu3 %v818_v16  ;;  %v793_v51 = vld [vmem:[#allocation7 + $0x20] sm:$0xf]  ;;  %v989_v53 = vld [vmem:[#allocation7 + $0x24] sm:$0xf]  ;;  %v795_v55 = vld [vmem:[#allocation7 + $0x28] sm:$0xf0] }
  0x27   :  { %230 = vmatpush.bf16.msra.mxu1 %v730_v38  ;;  %v798_v56 = vor.u32 %v989_v53, %v795_v55  ;;  %v865_v57 = vld [vmem:[#allocation7 + $0xb0] sm:$0xf]  ;;  %v1008_v58 = vld [vmem:[#allocation7 + $0xb4] sm:$0xf0]  ;;  %v867_v61 = vld [vmem:[#allocation7 + $0xb8] sm:$0xf0] }
  0x28   :  { %244 = vmatpush.bf16.msra.mxu2 %v734_v40  ;;  %473 = vmatpush.bf16.msrb.mxu0 %v882_v27  ;;  %v992_v40 = vld [vmem:[#allocation7 + $0x34] sm:$0xf0]  ;;  %v866_v59 = vor.u32 %v1008_v58, %v865_v57  ;;  %v785_v63 = vld [vmem:[#allocation7 + $0x10] sm:$0xf]  ;;  %v987_v1 = vld [vmem:[#allocation7 + $0x14] sm:$0xf] }
  0x29   :  { %v802_v42 = vor.u32 %v992_v40, %v801_v39  ;;  %v988_v0 = vld [vmem:[#allocation7 + $0x14] sm:$0xf0]  ;;  %v787_v3 = vld [vmem:[#allocation7 + $0x18] sm:$0xf0]  ;;  %v857_v5 = vld [vmem:[#allocation7 + $0xa0] sm:$0xf] }
  0x2a   :  { %460 = vmatpush.bf16.msra.mxu3 %v810_v29  ;;  %v786_v2 = vor.u32 %v988_v0, %v785_v63  ;;  %v1005_v7 = vld [vmem:[#allocation7 + $0xa4] sm:$0xf]  ;;  %v859_v9 = vld [vmem:[#allocation7 + $0xa8] sm:$0xf0]  ;;  %v777_v11 = vld [vmem:[#allocation7] sm:$0xf] }
  0x2b   :  { %231 = vmatpush.bf16.msra.mxu1 %v722_v44  ;;  %v806_v44 = vor.u32 %v991_v41, %v803_v43  ;;  %v862_v10 = vor.u32 %v1005_v7, %v859_v9  ;;  %v986_v12 = vld [vmem:[#allocation7 + $0x4] sm:$0xf0]  ;;  %v985_v13 = vld [vmem:[#allocation7 + $0x4] sm:$0xf]  ;;  %v779_v15 = vld [vmem:[#allocation7 + $0x8] sm:$0xf0] }
  0x2c   :  { %245 = vmatpush.bf16.msra.mxu2 %v726_v46  ;;  %v1010_v46 = vld [vmem:[#allocation7 + $0xc4] sm:$0xf0]  ;;  %v778_v14 = vor.u32 %v986_v12, %v777_v11  ;;  %v782_v16 = vor.u32 %v985_v13, %v779_v15  ;;  %v1004_v18 = vld [vmem:[#allocation7 + $0x94] sm:$0xf0]  ;;  %v1003_v19 = vld [vmem:[#allocation7 + $0x94] sm:$0xf] }
  0x2d   :  { %v874_v48 = vor.u32 %v1010_v46, %v873_v45  ;;  %v851_v21 = vld [vmem:[#allocation7 + $0x98] sm:$0xf0]  ;;  %v841_v23 = vld [vmem:[#allocation7 + $0x80] sm:$0xf]  ;;  %v1002_v24 = vld [vmem:[#allocation7 + $0x84] sm:$0xf0] }
  0x2e   :  { %461 = vmatpush.bf16.msra.mxu3 %v802_v42  ;;  %v854_v22 = vor.u32 %v1003_v19, %v851_v21  ;;  %v1001_v25 = vld [vmem:[#allocation7 + $0x84] sm:$0xf]  ;;  %v842_v26 = vor.u32 %v1002_v24, %v841_v23  ;;  %v843_v27 = vld [vmem:[#allocation7 + $0x88] sm:$0xf0]  ;;  %v1018_v57 = vld [vmem:[%s1387_s7 + $0x8] sm:$0xff]  ;;  %s686_s13 = sshll.u32 %s1152_s12, 4  ;;  %s687_s13 = int_to_ptr.vmem [resolvable:$true] %s686_s13 }
  0x2f   :  { %232 = vmatpush.bf16.msra.mxu1 %v714_v50  ;;  %v878_v50 = vor.u32 %v1009_v47, %v875_v49  ;;  %474 = vmatpush.bf16.msrb.mxu0 %v874_v48  ;;  %v1024_v29 = vld [vmem:[%s1387_s7 + $0x38] sm:$0xff]  ;;  %v1022_v49 = vld [vmem:[%s1387_s7 + $0x28] sm:$0xff]  ;;  %v1019_v55 = vld [vmem:[%s1387_s7 + $0x10] sm:$0xff] }
  0x30   :  { %246 = vmatpush.bf16.msra.mxu2 %v718_v52  ;;  %v990_v52 = vld [vmem:[#allocation7 + $0x24] sm:$0xf0]  ;;  %v1027_v58 = vld [vmem:[%s1387_s7 + $0x50] sm:$0xff]  ;;  %v291_v63 = vld [vmem:[%s1386_s6] sm:$0x3] }
  0x31   :  { %v794_v54 = vor.u32 %v990_v52, %v793_v51  ;;  %v1021_v51 = vld [vmem:[%s1387_s7 + $0x20] sm:$0xff]  ;;  %v1030_v52 = vld [vmem:[%s1387_s7 + $0x68] sm:$0xff]  ;;  %v1020_v53 = vld [vmem:[%s1387_s7 + $0x18] sm:$0xff] }
  0x32   :  { %v1042_v23 = vld [vmem:[%s1388_s8] ss:$0 sm:$0xff] }
  0x33   :  { %485 = vmatpush.bf16.msrb.mxu1 %v838_v60  ;;  %462 = vmatpush.bf16.msra.mxu3 %v794_v54  ;;  %v1007_v60 = vld [vmem:[#allocation7 + $0xb4] sm:$0xf] }
  0x34   :  { %499 = vmatpush.bf16.msrb.mxu2 %v902_v6  ;;  %v870_v62 = vor.u32 %v1007_v60, %v867_v61  ;;  %475 = vmatpush.bf16.msrb.mxu0 %v866_v59  ;;  %v1006_v6 = vld [vmem:[#allocation7 + $0xa4] sm:$0xf0]  ;;  %v1029_v54 = vld [vmem:[%s1387_s7 + $0x60] sm:$0xff]  ;;  %v1026_v60 = vld [vmem:[%s1387_s7 + $0x48] sm:$0xff] }
  0x35   :  { %v858_v8 = vor.u32 %v1006_v6, %v857_v5  ;;  %v1017_v59 = vld [vmem:[%s1387_s7] sm:$0xff]  ;;  %v294_v5 = vperm.slane %v291_v63, 1 }
  0x36   :  { %v1025_v61 = vld [vmem:[%s1387_s7 + $0x40] sm:$0xff] }
  0x37   :  { %486 = vmatpush.bf16.msrb.mxu1 %v830_v4  ;;  %v790_v4 = vor.u32 %v987_v1, %v787_v3  ;;  %463 = vmatpush.bf16.msra.mxu3 %v786_v2  ;;  %v293_v2 = vperm.slane %v291_v63, 0 }
  0x38   :  { %500 = vmatpush.bf16.msrb.mxu2 %v894_v17  ;;  %476 = vmatpush.bf16.msrb.mxu0 %v858_v8  ;;  %v849_v17 = vld [vmem:[#allocation7 + $0x90] sm:$0xf] }
  0x3b   :  { %487 = vmatpush.bf16.msrb.mxu1 %v822_v20  ;;  %464 = vmatpush.bf16.msra.mxu3 %v778_v14  ;;  %v850_v20 = vor.u32 %v1004_v18, %v849_v17 }
  0x3c   :  { %501 = vmatpush.bf16.msrb.mxu2 %v886_v28  ;;  %v846_v28 = vor.u32 %v1001_v25, %v843_v27 }
  0x3d   :  { %477 = vmatpush.bf16.msrb.mxu0 %v850_v20 }
  0x3f   :  { %488 = vmatpush.bf16.msrb.mxu1 %v814_v30  ;;  %v1032_v30 = vld [vmem:[%s1387_s7 + $0x78] sm:$0xff]  ;;  %651 = vmatpush.bf16.msrb.mxu3 %v1024_v29 }
  0x40   :  { %502 = vmatpush.bf16.msrb.mxu2 %v878_v50  ;;  %v1031_v50 = vld [vmem:[%s1387_s7 + $0x70] sm:$0xff] }
  0x41   :  { %478 = vmatpush.bf16.msrb.mxu0 %v842_v26 }
  0x43   :  { %489 = vmatpush.bf16.msrb.mxu1 %v806_v44 }
  0x44   :  { %503 = vmatpush.bf16.msrb.mxu2 %v870_v62 }
  0x45   :  { %665 = vmatpush.bf16.msra.mxu0 %v1032_v30 }
  0x47   :  { %490 = vmatpush.bf16.msrb.mxu1 %v798_v56  ;;  %v1028_v56 = vld [vmem:[%s1387_s7 + $0x58] sm:$0xff] }
  0x48   :  { %504 = vmatpush.bf16.msrb.mxu2 %v862_v10 }
  0x49   :  { %666 = vmatpush.bf16.msra.mxu0 %v1031_v50 }
  0x4b   :  { %491 = vmatpush.bf16.msrb.mxu1 %v790_v4 }
  0x4c   :  { %505 = vmatpush.bf16.msrb.mxu2 %v854_v22 }
  0x4d   :  { %667 = vmatpush.bf16.msra.mxu0 %v1030_v52 }
  0x4f   :  { %492 = vmatpush.bf16.msrb.mxu1 %v782_v16 }
  0x50   :  { %506 = vmatpush.bf16.msrb.mxu2 %v846_v28 }
  0x51   :  { %668 = vmatpush.bf16.msra.mxu0 %v1029_v54 }
  0x55   :  { %669 = vmatpush.bf16.msra.mxu0 %v1028_v56 }
  0x59   :  { %670 = vmatpush.bf16.msra.mxu0 %v1027_v58 }
  0x5d   :  { %671 = vmatpush.bf16.msra.mxu0 %v1026_v60 }
  0x61   :  { %672 = vmatpush.bf16.msra.mxu0 %v1025_v61 }
  0x94   :  { %v115_v31 = vpop.f32.mrf.mxu0 }
  0x95   :  { %v116_v33 = vadd.f32 %v1041_v32, %v115_v31  ;;  %v1023_v31 = vld [vmem:[%s1387_s7 + $0x30] sm:$0xff] }
  0x96   :  { %652 = vmatpush.bf16.msrb.mxu3 %v1023_v31 }
  0x97   :  { %v120_v36 = vmax.f32 %v116_v33, 0.0 }
  0x9a   :  { %653 = vmatpush.bf16.msrb.mxu3 %v1022_v49 }
  0x9c   :  { %v117_v34 = vpop.f32.mrf.mxu0 }
  0x9d   :  { %v118_v35 = vadd.f32 %v1041_v32, %v117_v34  ;;  %v139_v32 = vld [vmem:[%s1384_s4] sm:$0x3] }
  0x9e   :  { %v141_v34 = vperm.slane %v139_v32, 0  ;;  %654 = vmatpush.bf16.msrb.mxu3 %v1021_v51 }
  0x9f   :  { %v121_v37 = vmax.f32 %v118_v35, 0.0 }
  0xa1   :  { %v122_v38 = vpack.c.bf16 %v121_v37, %v120_v36 }
  0xa2   :  { %655 = vmatpush.bf16.msrb.mxu3 %v1020_v53 }
  0xa3   :  { %233 = vmatmul.bf16.vlgmr.msra.gmra.mxu1 %v122_v38  ;;  %247 = vmatmul.bf16.vlgmr.msra.gmra.mxu2 %v122_v38  ;;  %v142_v38 = vperm.slane %v139_v32, 1 }
  0xa6   :  { %656 = vmatpush.bf16.msrb.mxu3 %v1019_v55 }
  0xaa   :  { %657 = vmatpush.bf16.msrb.mxu3 %v1018_v57 }
  0xae   :  { %658 = vmatpush.bf16.msrb.mxu3 %v1017_v59 }
 0x120   :  { %v234_v33 = vpop.f32.mrf.mxu1 }
 0x121   :  { %v235_v36 = vadd.f32 %v234_v33, %v141_v34 }
 0x123   :  { %v253_v40 = vmax.f32 %v235_v36, 0.0 }
 0x126   :  { %v248_v35 = vpop.f32.mrf.mxu2 }
 0x127   :  { %v249_v42 = vadd.f32 %v248_v35, %v142_v38 }
 0x128   :  { %v236_v37 = vpop.f32.mrf.mxu1 }
 0x129   :  { %v237_v39 = vadd.f32 %v236_v37, %v141_v34  ;;  %v254_v46 = vmax.f32 %v249_v42, 0.0 }
 0x12b   :  { %v255_v41 = vmax.f32 %v237_v39, 0.0 }
 0x12d   :  { %v257_v43 = vpack.c.bf16 %v255_v41, %v253_v40 }
 0x12e   :  { %v250_v44 = vpop.f32.mrf.mxu2 }
 0x12f   :  { %v251_v45 = vadd.f32 %v250_v44, %v142_v38  ;;  %465 = vmatmul.bf16.vlgmr.msra.gmra.mxu3 %v257_v43  ;;  %493 = vmatmul.bf16.vlgmr.msrb.gmra.mxu1 %v257_v43 }
 0x131   :  { %v256_v47 = vmax.f32 %v251_v45, 0.0 }
 0x133   :  { %v258_v48 = vpack.c.bf16 %v256_v47, %v254_v46 }
 0x135   :  { %479 = vmatmul.bf16.vlgmr.msrb.gmra.mxu0 %v258_v48  ;;  %507 = vmatmul.bf16.vlgmr.msrb.gmra.mxu2 %v258_v48 }
 0x1ac   :  { %v494_v62 = vpop.f32.mrf.mxu1 }
 0x1ad   :  { %v495_v11 = vadd.f32 %v494_v62, %v294_v5 }
 0x1b2   :  { %v466_v0 = vpop.f32.mrf.mxu3  ;;  %v480_v1 = vpop.f32.mrf.mxu0 }
 0x1b3   :  { %v467_v3 = vadd.f32 %v466_v0, %v293_v2 }
 0x1b4   :  { %v496_v9 = vpop.f32.mrf.mxu1 }
 0x1b5   :  { %v481_v7 = vadd.f32 %v480_v1, %v467_v3  ;;  %v497_v14 = vadd.f32 %v496_v9, %v294_v5 }
 0x1b7   :  { %v513_v13 = vmax.f32 %v481_v7, 0.0 }
 0x1b8   :  { %v508_v4 = vpop.f32.mrf.mxu2 }
 0x1b9   :  { %v509_v15 = vadd.f32 %v508_v4, %v495_v11 }
 0x1ba   :  { %v468_v6 = vpop.f32.mrf.mxu3  ;;  %v482_v10 = vpop.f32.mrf.mxu0 }
 0x1bb   :  { %v469_v8 = vadd.f32 %v468_v6, %v293_v2  ;;  %v514_v20 = vmax.f32 %v509_v15, 0.0 }
 0x1bd   :  { %v483_v12 = vadd.f32 %v482_v10, %v469_v8 }
 0x1bf   :  { %v515_v16 = vmax.f32 %v483_v12, 0.0 }
 0x1c0   :  { %v510_v17 = vpop.f32.mrf.mxu2 }
 0x1c1   :  { %v517_v18 = vpack.c.bf16 %v515_v16, %v513_v13  ;;  %v511_v19 = vadd.f32 %v510_v17, %v497_v14 }
 0x1c3   :  { %v516_v21 = vmax.f32 %v511_v19, 0.0  ;;  %659 = vmatmul.bf16.vlgmr.msrb.gmra.mxu3 %v517_v18 }
 0x1c5   :  { %v518_v22 = vpack.c.bf16 %v516_v21, %v514_v20 }
 0x1c7   :  { %673 = vmatmul.bf16.vlgmr.msra.gmra.mxu0 %v518_v22 }
 0x244   :  { %v674_v24 = vpop.f32.mrf.mxu0 }
 0x246   :  { %v660_v25 = vpop.f32.mrf.mxu3 }
 0x247   :  { %v661_v26 = vadd.f32 %v1042_v23, %v660_v25 }
 0x249   :  { %v675_v27 = vadd.f32 %v674_v24, %v661_v26 }
 0x24b   :  { %680 = vst.msk [vmem:[#allocation8] sm:$0xff] %vm679_vm1, %v675_v27 }
 0x24c   :  { %v676_v30 = vpop.f32.mrf.mxu0 }
 0x24e   :  { %v662_v28 = vpop.f32.mrf.mxu3 }
 0x24f   :  { %v663_v29 = vadd.f32 %v1042_v23, %v662_v28 }
 0x251   :  { %v677_v31 = vadd.f32 %v676_v30, %v663_v29 }
 0x253   :  { %681 = vst.msk [vmem:[#allocation8 + $0x8] sm:$0xff] %vm679_vm1, %v677_v31 }
 0x254   :  { %694 = dma.vmem_to_hbm [thread:$0]  %s687_s13, 256, %s689_s16, [#allocation4], %s1150_s25, %s1150_s25, %s1151_s26  }
 0x255   :  { %1143 = dma.done.wait [#allocation4], 256  }
 0x256   :  { %1144 = vsyncadd [#allocation4], 4294967040 }
 0x257   :  { %699 = vsyncpa [#allocation3], 1 }
 0x258   :  { %700 = vsyncpa [#allocation6], 1 }
 0x259   :  { %701 = vsyncpa [#allocation4], 1 }

</bundles_post_ra>
